<compile_context>
chip_gen: v7x
topology: tpu7x:2x2x1
jax: 0.10.0
libtpu: 0.0.40
codegen_flags: <defaults>
</compile_context>

<pallas_src>
import functools

import jax
import jax.numpy as jnp
from jax.experimental import pallas as pl
from jax.experimental.pallas import tpu as pltpu


def _ae_kernel(x_ref, w_ref, b_ref, enc_ref, dec_ref):
    """x_ref: (TB, P); w_ref: (4, P, P); b_ref: (4, 1, P); outputs: (TB, P)."""
    h = x_ref[...]                       # (TB, P) in compute dtype (bf16 or f32)
    cd = h.dtype

    def layer(h_in, i):
        # MXU matmul with f32 accumulation; bias add + tanh in f32 (v5e-safe).
        acc = jnp.dot(h_in, w_ref[i], preferred_element_type=jnp.float32)
        b = b_ref[i].astype(jnp.float32)             # (1, P)
        return jnp.tanh(acc + b)                     # (TB, P) f32

    h1 = layer(h, 0)                    # encoder Linear(sqe->h1) + Tanh
    enc = layer(h1.astype(cd), 1)       # encoder Linear(h1->emb) + Tanh
    h2 = layer(enc.astype(cd), 2)       # decoder Linear(emb->h1) + Tanh
    dec = layer(h2.astype(cd), 3)       # decoder Linear(h1->sqe) + Tanh

    enc_ref[...] = enc.astype(enc_ref.dtype)
    dec_ref[...] = dec.astype(dec_ref.dtype)


def _round_up(n, m):
    return ((n + m - 1) // m) * m


@functools.partial(jax.jit, static_argnames=("tile_b", "compute_dtype"))
def autoencoder_forward(x, params, *, tile_b=1024, compute_dtype=jnp.bfloat16):
    """x: (B, sqe_len). params: dict with pre-transposed (in, out) weights."""
    B, sqe_len = x.shape
    w1, b1 = params["w1"], params["b1"]    # (sqe_len, hidden1), (1, hidden1)
    w2, b2 = params["w2"], params["b2"]    # (hidden1, embed_len), (1, embed_len)
    w3, b3 = params["w3"], params["b3"]    # (embed_len, hidden1), (1, hidden1)
    w4, b4 = params["w4"], params["b4"]    # (hidden1, sqe_len), (1, sqe_len)
    hidden1 = w1.shape[1]
    embed_len = w2.shape[1]
    out_dtype = x.dtype
    cd = jnp.dtype(compute_dtype)

    # Common lane-dense feature width (all dims padded to the same P so the
    # four weights pack into a single (4, P, P) buffer).
    P = _round_up(max(sqe_len, hidden1, embed_len), 128)

    # Batch tile: large (multiple of 8); at least 2 grid steps for v7x megacore
    # when the batch allows it.
    B8 = _round_up(B, 8)
    tb = max(8, (int(tile_b) // 8) * 8)
    tb = min(tb, B8)
    if B8 // tb < 2 and B8 >= 16:
        tb = _round_up(pl.cdiv(B, 2), 8)
    Bp = _round_up(B, tb)
    grid = (Bp // tb,)

    def padw(w, rin, cin):
        return jnp.pad(w, ((0, P - rin), (0, P - cin))).astype(cd)

    def padb(b, cin):
        return jnp.pad(b, ((0, 0), (0, P - cin))).astype(cd)

    # Pack weights / biases -> 2 grid-resident broadcast DMAs instead of 8.
    w_packed = jnp.stack([padw(w1, sqe_len, hidden1),
                          padw(w2, hidden1, embed_len),
                          padw(w3, embed_len, hidden1),
                          padw(w4, hidden1, sqe_len)])            # (4, P, P)
    b_packed = jnp.stack([padb(b1, hidden1), padb(b2, embed_len),
                          padb(b3, hidden1), padb(b4, sqe_len)])  # (4, 1, P)

    # Zero-pad x in batch (to a multiple of tb) and features (to P).
    x_pad = jnp.pad(x, ((0, Bp - B), (0, P - sqe_len))).astype(cd)  # (Bp, P)

    flops = 2 * Bp * 4 * P * P
    transcendentals = 4 * Bp * P
    bytes_accessed = (x_pad.size * cd.itemsize
                      + 2 * Bp * P * jnp.dtype(out_dtype).itemsize
                      + w_packed.size * cd.itemsize
                      + b_packed.size * cd.itemsize)

    enc_pad, dec_pad = pl.pallas_call(
        _ae_kernel,
        out_shape=(jax.ShapeDtypeStruct((Bp, P), out_dtype),
                   jax.ShapeDtypeStruct((Bp, P), out_dtype)),
        grid=grid,
        in_specs=[
            pl.BlockSpec((tb, P), lambda i: (i, 0)),
            pl.BlockSpec((4, P, P), lambda i: (0, 0, 0)),   # grid-resident
            pl.BlockSpec((4, 1, P), lambda i: (0, 0, 0)),   # grid-resident
        ],
        out_specs=(
            pl.BlockSpec((tb, P), lambda i: (i, 0)),
            pl.BlockSpec((tb, P), lambda i: (i, 0)),
        ),
        compiler_params=pltpu.CompilerParams(
            dimension_semantics=("parallel",)),
        cost_estimate=pl.CostEstimate(
            flops=flops,
            transcendentals=transcendentals,
            bytes_accessed=bytes_accessed),
    )(x_pad, w_packed, b_packed)

    # Strip the zero padding (semantics identical to the torch module).
    return enc_pad[:B, :embed_len], dec_pad[:B, :sqe_len]


def init_params(key, sqe_len, hidden1, embed_len):
    """Deterministic synthetic params. Weights stored as (in, out) == torch W.T."""
    ks = jax.random.split(key, 8)

    def lin(kw, kb, fan_in, fan_out):
        # torch nn.Linear default: U(-1/sqrt(fan_in), 1/sqrt(fan_in))
        bound = 1.0 / jnp.sqrt(fan_in)
        w = jax.random.uniform(kw, (fan_in, fan_out), jnp.float32, -bound, bound)
        b = jax.random.uniform(kb, (1, fan_out), jnp.float32, -bound, bound)
        return w, b

    w1, b1 = lin(ks[0], ks[1], sqe_len, hidden1)
    w2, b2 = lin(ks[2], ks[3], hidden1, embed_len)
    w3, b3 = lin(ks[4], ks[5], embed_len, hidden1)
    w4, b4 = lin(ks[6], ks[7], hidden1, sqe_len)
    return dict(w1=w1, b1=b1, w2=w2, b2=b2, w3=w3, b3=b3, w4=w4, b4=b4)


def reference_forward(x, p):
    h1 = jnp.tanh(x @ p["w1"] + p["b1"])
    enc = jnp.tanh(h1 @ p["w2"] + p["b2"])
    h2 = jnp.tanh(enc @ p["w3"] + p["b3"])
    dec = jnp.tanh(h2 @ p["w4"] + p["b4"])
    return enc, dec


if __name__ == "__main__":
    # Small shapes implied by the module: x is (batch, sqe_len).
    batch, sqe_len, hidden1, embed_len = 8, 32, 16, 8

    key = jax.random.PRNGKey(0)
    kx, kp = jax.random.split(key)
    x = jax.random.normal(kx, (batch, sqe_len), dtype=jnp.float32)
    params = init_params(kp, sqe_len, hidden1, embed_len)
    enc_ref, dec_ref = reference_forward(x, params)

    # Exact f32 path (strict check).
    enc32, dec32 = autoencoder_forward(x, params, compute_dtype=jnp.float32)
    jax.block_until_ready((enc32, dec32))
    assert enc32.shape == (batch, embed_len) and dec32.shape == (batch, sqe_len)
    assert jnp.allclose(enc32, enc_ref, atol=1e-5, rtol=1e-5)
    assert jnp.allclose(dec32, dec_ref, atol=1e-5, rtol=1e-5)

    # Default bf16-storage / bf16-MXU-input path (HBM-bandwidth optimized).
    enc16, dec16 = autoencoder_forward(x, params)
    jax.block_until_ready((enc16, dec16))
    assert enc16.shape == (batch, embed_len) and dec16.shape == (batch, sqe_len)
    assert jnp.allclose(enc16, enc_ref, atol=5e-2, rtol=5e-2)
    assert jnp.allclose(dec16, dec_ref, atol=5e-2, rtol=5e-2)

    print("KERNEL_OK")
</pallas_src>

<mosaic_0001>
module attributes {stable_mosaic.version = 11 : i64} {
  func.func @_ae_kernel(%arg0: i32, %arg1: memref<8x128xf32, #tpu.memory_space<vmem>>, %arg2: memref<4x128x128xf32, #tpu.memory_space<vmem>>, %arg3: memref<4x1x128xf32, #tpu.memory_space<vmem>>, %arg4: memref<8x128xf32, #tpu.memory_space<vmem>>, %arg5: memref<8x128xf32, #tpu.memory_space<vmem>>) attributes {dimension_semantics = [#tpu.dimension_semantics<parallel>], iteration_bounds = array<i64: 1>, scalar_prefetch = 0 : i64, scratch_operands = 0 : i64, tpu.core_type = #tpu.core_type<tc>, window_params = [{transform_indices = @transform_0, window_bounds = array<i64: 8, 128>}, {pipeline_mode = #tpu.pipeline_mode<synchronous>, transform_indices = @transform_1, window_bounds = array<i64: 4, 128, 128>}, {pipeline_mode = #tpu.pipeline_mode<synchronous>, transform_indices = @transform_2, window_bounds = array<i64: 4, 1, 128>}, {transform_indices = @transform_3, window_bounds = array<i64: 8, 128>}, {transform_indices = @transform_4, window_bounds = array<i64: 8, 128>}]} {
    %c0 = arith.constant 0 : index
    %c0_0 = arith.constant 0 : index
    %0 = vector.load %arg1[%c0, %c0_0] : memref<8x128xf32, #tpu.memory_space<vmem>>, vector<8x128xf32>
    %c0_1 = arith.constant 0 : index
    %c0_2 = arith.constant 0 : index
    %c0_3 = arith.constant 0 : index
    %1 = vector.load %arg2[%c0_1, %c0_2, %c0_3] : memref<4x128x128xf32, #tpu.memory_space<vmem>>, vector<1x128x128xf32>
    %2 = vector.shape_cast %1 : vector<1x128x128xf32> to vector<128x128xf32>
    %cst = arith.constant dense<0.000000e+00> : vector<8x128xf32>
    %3 = tpu.matmul %0, %2, %cst {dimension_numbers = #tpu.dot_dimension_numbers<[1], [0], [0], [1], [0, 0, 1, 1], [], []>} : vector<8x128xf32>, vector<128x128xf32>, vector<8x128xf32> -> vector<8x128xf32>
    %c0_4 = arith.constant 0 : index
    %c0_5 = arith.constant 0 : index
    %c0_6 = arith.constant 0 : index
    %4 = vector.load %arg3[%c0_4, %c0_5, %c0_6] : memref<4x1x128xf32, #tpu.memory_space<vmem>>, vector<1x1x128xf32>
    %5 = vector.shape_cast %4 : vector<1x1x128xf32> to vector<1x128xf32>
    %6 = vector.broadcast %5 : vector<1x128xf32> to vector<8x128xf32>
    %7 = arith.addf %3, %6 : vector<8x128xf32>
    %8 = math.tanh %7 : vector<8x128xf32>
    %c1 = arith.constant 1 : index
    %c0_7 = arith.constant 0 : index
    %c0_8 = arith.constant 0 : index
    %9 = vector.load %arg2[%c1, %c0_7, %c0_8] : memref<4x128x128xf32, #tpu.memory_space<vmem>>, vector<1x128x128xf32>
    %10 = vector.shape_cast %9 : vector<1x128x128xf32> to vector<128x128xf32>
    %cst_9 = arith.constant dense<0.000000e+00> : vector<8x128xf32>
    %11 = tpu.matmul %8, %10, %cst_9 {dimension_numbers = #tpu.dot_dimension_numbers<[1], [0], [0], [1], [0, 0, 1, 1], [], []>} : vector<8x128xf32>, vector<128x128xf32>, vector<8x128xf32> -> vector<8x128xf32>
    %c1_10 = arith.constant 1 : index
    %c0_11 = arith.constant 0 : index
    %c0_12 = arith.constant 0 : index
    %12 = vector.load %arg3[%c1_10, %c0_11, %c0_12] : memref<4x1x128xf32, #tpu.memory_space<vmem>>, vector<1x1x128xf32>
    %13 = vector.shape_cast %12 : vector<1x1x128xf32> to vector<1x128xf32>
    %14 = vector.broadcast %13 : vector<1x128xf32> to vector<8x128xf32>
    %15 = arith.addf %11, %14 : vector<8x128xf32>
    %16 = math.tanh %15 : vector<8x128xf32>
    %c2 = arith.constant 2 : index
    %c0_13 = arith.constant 0 : index
    %c0_14 = arith.constant 0 : index
    %17 = vector.load %arg2[%c2, %c0_13, %c0_14] : memref<4x128x128xf32, #tpu.memory_space<vmem>>, vector<1x128x128xf32>
    %18 = vector.shape_cast %17 : vector<1x128x128xf32> to vector<128x128xf32>
    %cst_15 = arith.constant dense<0.000000e+00> : vector<8x128xf32>
    %19 = tpu.matmul %16, %18, %cst_15 {dimension_numbers = #tpu.dot_dimension_numbers<[1], [0], [0], [1], [0, 0, 1, 1], [], []>} : vector<8x128xf32>, vector<128x128xf32>, vector<8x128xf32> -> vector<8x128xf32>
    %c2_16 = arith.constant 2 : index
    %c0_17 = arith.constant 0 : index
    %c0_18 = arith.constant 0 : index
    %20 = vector.load %arg3[%c2_16, %c0_17, %c0_18] : memref<4x1x128xf32, #tpu.memory_space<vmem>>, vector<1x1x128xf32>
    %21 = vector.shape_cast %20 : vector<1x1x128xf32> to vector<1x128xf32>
    %22 = vector.broadcast %21 : vector<1x128xf32> to vector<8x128xf32>
    %23 = arith.addf %19, %22 : vector<8x128xf32>
    %24 = math.tanh %23 : vector<8x128xf32>
    %c3 = arith.constant 3 : index
    %c0_19 = arith.constant 0 : index
    %c0_20 = arith.constant 0 : index
    %25 = vector.load %arg2[%c3, %c0_19, %c0_20] : memref<4x128x128xf32, #tpu.memory_space<vmem>>, vector<1x128x128xf32>
    %26 = vector.shape_cast %25 : vector<1x128x128xf32> to vector<128x128xf32>
    %cst_21 = arith.constant dense<0.000000e+00> : vector<8x128xf32>
    %27 = tpu.matmul %24, %26, %cst_21 {dimension_numbers = #tpu.dot_dimension_numbers<[1], [0], [0], [1], [0, 0, 1, 1], [], []>} : vector<8x128xf32>, vector<128x128xf32>, vector<8x128xf32> -> vector<8x128xf32>
    %c3_22 = arith.constant 3 : index
    %c0_23 = arith.constant 0 : index
    %c0_24 = arith.constant 0 : index
    %28 = vector.load %arg3[%c3_22, %c0_23, %c0_24] : memref<4x1x128xf32, #tpu.memory_space<vmem>>, vector<1x1x128xf32>
    %29 = vector.shape_cast %28 : vector<1x1x128xf32> to vector<1x128xf32>
    %30 = vector.broadcast %29 : vector<1x128xf32> to vector<8x128xf32>
    %31 = arith.addf %27, %30 : vector<8x128xf32>
    %32 = math.tanh %31 : vector<8x128xf32>
    %c0_25 = arith.constant 0 : index
    %c0_26 = arith.constant 0 : index
    %33 = vector.load %arg4[%c0_25, %c0_26] : memref<8x128xf32, #tpu.memory_space<vmem>>, vector<8x128xf32>
    tpu.vector_store %arg4[%c0_25, %c0_26], %16 {strides = array<i32>} : memref<8x128xf32, #tpu.memory_space<vmem>>, vector<8x128xf32>,
    %c0_27 = arith.constant 0 : index
    %c0_28 = arith.constant 0 : index
    %34 = vector.load %arg5[%c0_27, %c0_28] : memref<8x128xf32, #tpu.memory_space<vmem>>, vector<8x128xf32>
    tpu.vector_store %arg5[%c0_27, %c0_28], %32 {strides = array<i32>} : memref<8x128xf32, #tpu.memory_space<vmem>>, vector<8x128xf32>,
    return
  }
  func.func @transform_0(%arg0: i32) -> (i32, i32) {
    %c0_i32 = arith.constant 0 : i32
    %c0_i32_0 = arith.constant 0 : i32
    return %arg0, %c0_i32 : i32, i32
  }
  func.func @transform_1(%arg0: i32) -> (i32, i32, i32) {
    %c0_i32 = arith.constant 0 : i32
    %c0_i32_0 = arith.constant 0 : i32
    %c0_i32_1 = arith.constant 0 : i32
    %c0_i32_2 = arith.constant 0 : i32
    return %c0_i32, %c0_i32_0, %c0_i32_1 : i32, i32, i32
  }
  func.func @transform_2(%arg0: i32) -> (i32, i32, i32) {
    %c0_i32 = arith.constant 0 : i32
    %c0_i32_0 = arith.constant 0 : i32
    %c0_i32_1 = arith.constant 0 : i32
    %c0_i32_2 = arith.constant 0 : i32
    return %c0_i32, %c0_i32_0, %c0_i32_1 : i32, i32, i32
  }
  func.func @transform_3(%arg0: i32) -> (i32, i32) {
    %c0_i32 = arith.constant 0 : i32
    %c0_i32_0 = arith.constant 0 : i32
    return %arg0, %c0_i32 : i32, i32
  }
  func.func @transform_4(%arg0: i32) -> (i32, i32) {
    %c0_i32 = arith.constant 0 : i32
    %c0_i32_0 = arith.constant 0 : i32
    return %arg0, %c0_i32 : i32, i32
  }
}

</mosaic_0001>

<bundles_post_ra>
// kernel: autoencoder_forward.1
= control target key start
LH: loop header
LB: loop body
LE: loop exit
PB: predicated region body
PF: predicated region fallthrough
CT: control target
= control target key end

     0   :  { %10 = vsyncpa [#allocation3], 0  ;;  %v851_v3 = vmov 0.0|0.0   ;;  %vm852_vm0 = vmmov 0   ;;  %v853_v6 = vmov 0.0   ;;  %s1152_s0 = inlined_call_operand.vmem [shape: f32[8,128], index: 0, kind: input, shape index: {}]   ;;  %s1153_s1 = inlined_call_operand.vmem [shape: f32[4,128,128], index: 1, kind: input, shape index: {}]   ;;  %s1154_s2 = inlined_call_operand.vmem [shape: f32[4,1,128], index: 2, kind: input, shape index: {}]   ;;  %s1155_s3 = inlined_call_operand.hbm [shape: f32[8,128], index: 3, kind: output, shape index: {0}]   ;;  %s1156_s4 = inlined_call_operand.hbm [shape: f32[8,128], index: 4, kind: output, shape index: {1}]  }
   0x1   :  { %v19_v0 = vld [vmem:[%s1153_s1] sm:$0xff]  ;;  %v20_v1 = vld [vmem:[%s1153_s1 + $0x8] sm:$0xff]  ;;  %v21_v2 = vld [vmem:[%s1153_s1 + $0x10] sm:$0xff]  ;;  %694 = vmatprep.subr.bf16.mxu0 %v851_v3  ;;  %586 = vmatprep.mubr.msk.f32.mxu0 %vm852_vm0, %v853_v6 }
   0x2   :  { %v695_v4 = vpack.c.bf16 %v20_v1, %v19_v0  ;;  %v22_v5 = vld [vmem:[%s1153_s1 + $0x18] sm:$0xff]  ;;  %718 = vmatprep.subr.bf16.mxu1 %v851_v3  ;;  %621 = vmatprep.mubr.msk.f32.mxu1 %vm852_vm0, %v853_v6  ;;  %v23_v8 = vld [vmem:[%s1153_s1 + $0x20] sm:$0xff]  ;;  %v24_v9 = vld [vmem:[%s1153_s1 + $0x28] sm:$0xff] }
   0x3   :  { %v698_v7 = vpack.c.bf16 %v22_v5, %v21_v2  ;;  %v432_v10 = vld [vmem:[%s1153_s1 + $0x80] sm:$0xff]  ;;  %v433_v11 = vld [vmem:[%s1153_s1 + $0x88] sm:$0xff]  ;;  %v434_v12 = vld [vmem:[%s1153_s1 + $0x90] sm:$0xff]  ;;  %v701_v14 = vpack.c.bf16 %v24_v9, %v23_v8 }
   0x4   :  { %696 = vmatpush3.bf16.msra.mxu0 %v695_v4  ;;  %v435_v13 = vld [vmem:[%s1153_s1 + $0x98] sm:$0xff]  ;;  %v719_v15 = vpack.c.bf16 %v433_v11, %v432_v10  ;;  %v25_v16 = vld [vmem:[%s1153_s1 + $0x30] sm:$0xff] }
   0x5   :  { %697 = vmatprep.subr.bf16.mxu0 %v851_v3  ;;  %v26_v17 = vld [vmem:[%s1153_s1 + $0x38] sm:$0xff]  ;;  %v722_v18 = vpack.c.bf16 %v435_v13, %v434_v12 }
   0x6   :  { %720 = vmatpush3.bf16.msra.mxu1 %v719_v15 }
   0x8   :  { %699 = vmatpush3.bf16.msra.mxu0 %v698_v7 }
   0x9   :  { %700 = vmatprep.subr.bf16.mxu0 %v851_v3 }
   0xa   :  { %11 = vsyncpa [#allocation5], 0  ;;  %721 = vmatprep.subr.bf16.mxu1 %v851_v3  ;;  %v436_v19 = vld [vmem:[%s1153_s1 + $0xa0] sm:$0xff]  ;;  %v437_v20 = vld [vmem:[%s1153_s1 + $0xa8] sm:$0xff]  ;;  %v704_v21 = vpack.c.bf16 %v26_v17, %v25_v16  ;;  %s854_s18 = smov [#allocation2]  }
   0xb   :  { %v27_v22 = vld [vmem:[%s1153_s1 + $0x40] sm:$0xff]  ;;  %v28_v23 = vld [vmem:[%s1153_s1 + $0x48] sm:$0xff]  ;;  %723 = vmatpush3.bf16.msra.mxu1 %v722_v18  ;;  %v725_v24 = vpack.c.bf16 %v437_v20, %v436_v19  ;;  %v438_v25 = vld [vmem:[%s1153_s1 + $0xb0] sm:$0xff]  ;;  %s409_s19 = sshll.u32 %s854_s18, 4  ;;  %s410_s19 = int_to_ptr.vmem [resolvable:$true] %s409_s19 }
   0xc   :  { %702 = vmatpush3.bf16.msra.mxu0 %v701_v14  ;;  %724 = vmatprep.subr.bf16.mxu1 %v851_v3  ;;  %v439_v26 = vld [vmem:[%s1153_s1 + $0xb8] sm:$0xff]  ;;  %v707_v27 = vpack.c.bf16 %v28_v23, %v27_v22  ;;  %v29_v28 = vld [vmem:[%s1153_s1 + $0x50] sm:$0xff]  ;;  %v440_v31 = vld [vmem:[%s1153_s1 + $0xc0] sm:$0xff]  ;;  %s803_s20 = scalar_lea.vmem %s410_s19, 128  ;;  %p808_p1 = scmp.lt.s32.totalorder %s410_s19, %s410_s19 }
   0xd   :  { %703 = vmatprep.subr.bf16.mxu0 %v851_v3  ;;  %v30_v29 = vld [vmem:[%s1153_s1 + $0x58] sm:$0xff]  ;;  %v728_v30 = vpack.c.bf16 %v439_v26, %v438_v25  ;;  %v441_v32 = vld [vmem:[%s1153_s1 + $0xc8] sm:$0xff]  ;;  %v31_v34 = vld [vmem:[%s1153_s1 + $0x60] sm:$0xff]  ;;  %p804_p0 = scmp.ne.s32.totalorder %s410_s19, %s803_s20  ;;  %p809_p2 = scmp.lt.s32.totalorder %s803_s20, %s803_s20 }
   0xe   :  { %v710_v33 = vpack.c.bf16 %v30_v29, %v29_v28  ;;  %v32_v35 = vld [vmem:[%s1153_s1 + $0x68] sm:$0xff]  ;;  %v731_v36 = vpack.c.bf16 %v441_v32, %v440_v31  ;;  %v33_v38 = vld [vmem:[%s1153_s1 + $0x70] sm:$0xff]  ;;  %v34_v39 = vld [vmem:[%s1153_s1 + $0x78] sm:$0xff] }
   0xf   :  { %726 = vmatpush3.bf16.msra.mxu1 %v725_v24  ;;  %v713_v37 = vpack.c.bf16 %v32_v35, %v31_v34  ;;  %v716_v40 = vpack.c.bf16 %v34_v39, %v33_v38  ;;  %v18_v41 = vld [vmem:[%s1152_s0] sm:$0xff]  ;;  %v442_v42 = vld [vmem:[%s1153_s1 + $0xd0] sm:$0xff]  ;;  %v443_v43 = vld [vmem:[%s1153_s1 + $0xd8] sm:$0xff]  ;;  %p810_p3 = por %p809_p2, %p808_p1 }
  0x10   :  { %705 = vmatpush3.bf16.msra.mxu0 %v704_v21  ;;  %727 = vmatprep.subr.bf16.mxu1 %v851_v3  ;;  %v734_v44 = vpack.c.bf16 %v443_v43, %v442_v42  ;;  %v444_v45 = vld [vmem:[%s1153_s1 + $0xe0] sm:$0xff]  ;;  %v445_v46 = vld [vmem:[%s1153_s1 + $0xe8] sm:$0xff]  ;;  %v446_v48 = vld [vmem:[%s1153_s1 + $0xf0] sm:$0xff] }
  0x11   :  { %706 = vmatprep.subr.bf16.mxu0 %v851_v3  ;;  %v737_v47 = vpack.c.bf16 %v445_v46, %v444_v45  ;;  %v447_v49 = vld [vmem:[%s1153_s1 + $0xf8] sm:$0xff]  ;;  %v450_v51 = vld [vmem:[%s1153_s1 + $0x100] sm:$0xff]  ;;  %v451_v52 = vld [vmem:[%s1153_s1 + $0x108] sm:$0xff]  ;;  %p811_p4 = pnand %p810_p3, %p804_p0 }
  0x12   :  { %v740_v50 = vpack.c.bf16 %v447_v49, %v446_v48  ;;  %v452_v53 = vld [vmem:[%s1153_s1 + $0x110] sm:$0xff]  ;;  %v743_v54 = vpack.c.bf16 %v451_v52, %v450_v51  ;;  %v453_v55 = vld [vmem:[%s1153_s1 + $0x118] sm:$0xff]  ;;  %v454_v57 = vld [vmem:[%s1153_s1 + $0x120] sm:$0xff] }
  0x13   :  { %729 = vmatpush3.bf16.msra.mxu1 %v728_v30  ;;  %v746_v56 = vpack.c.bf16 %v453_v55, %v452_v53  ;;  %v455_v58 = vld [vmem:[%s1153_s1 + $0x128] sm:$0xff]  ;;  %v456_v60 = vld [vmem:[%s1153_s1 + $0x130] sm:$0xff]  ;;  %v457_v61 = vld [vmem:[%s1153_s1 + $0x138] sm:$0xff] }
  0x14   :  { %708 = vmatpush3.bf16.msra.mxu0 %v707_v27  ;;  %730 = vmatprep.subr.bf16.mxu1 %v851_v3  ;;  %v749_v59 = vpack.c.bf16 %v455_v58, %v454_v57  ;;  %v752_v62 = vpack.c.bf16 %v457_v61, %v456_v60  ;;  %v458_v63 = vld [vmem:[%s1153_s1 + $0x140] sm:$0xff]  ;;  %v459_v0 = vld [vmem:[%s1153_s1 + $0x148] sm:$0xff]  ;;  %v460_v9 = vld [vmem:[%s1153_s1 + $0x150] sm:$0xff] }
  0x15   :  { %709 = vmatprep.subr.bf16.mxu0 %v851_v3  ;;  %v755_v1 = vpack.c.bf16 %v459_v0, %v458_v63  ;;  %v431_v2 = vld [vmem:[%s1154_s2] ss:$0 sm:$0xff]  ;;  %v461_v10 = vld [vmem:[%s1153_s1 + $0x158] sm:$0xff]  ;;  %v464_v14 = vld [vmem:[%s1153_s1 + $0x170] sm:$0xff] }
  0x16   :  { %v758_v11 = vpack.c.bf16 %v461_v10, %v460_v9  ;;  %v462_v12 = vld [vmem:[%s1153_s1 + $0x160] sm:$0xff]  ;;  %v465_v15 = vld [vmem:[%s1153_s1 + $0x178] sm:$0xff]  ;;  %v469_v18 = vld [vmem:[%s1153_s1 + $0x188] sm:$0xff] }
  0x17   :  { %732 = vmatpush3.bf16.msra.mxu1 %v731_v36  ;;  %v764_v16 = vpack.c.bf16 %v465_v15, %v464_v14  ;;  %v468_v17 = vld [vmem:[%s1153_s1 + $0x180] sm:$0xff]  ;;  %v470_v19 = vld [vmem:[%s1153_s1 + $0x190] sm:$0xff]  ;;  %v471_v21 = vld [vmem:[%s1153_s1 + $0x198] sm:$0xff] }
  0x18   :  { %711 = vmatpush3.bf16.msra.mxu0 %v710_v33  ;;  %733 = vmatprep.subr.bf16.mxu1 %v851_v3  ;;  %v767_v20 = vpack.c.bf16 %v469_v18, %v468_v17  ;;  %v770_v22 = vpack.c.bf16 %v471_v21, %v470_v19  ;;  %v472_v23 = vld [vmem:[%s1153_s1 + $0x1a0] sm:$0xff]  ;;  %v473_v24 = vld [vmem:[%s1153_s1 + $0x1a8] sm:$0xff]  ;;  %v474_v26 = vld [vmem:[%s1153_s1 + $0x1b0] sm:$0xff] }
  0x19   :  { %712 = vmatprep.subr.bf16.mxu0 %v851_v3  ;;  %v773_v25 = vpack.c.bf16 %v473_v24, %v472_v23  ;;  %v475_v27 = vld [vmem:[%s1153_s1 + $0x1b8] sm:$0xff]  ;;  %v476_v29 = vld [vmem:[%s1153_s1 + $0x1c0] sm:$0xff]  ;;  %v477_v30 = vld [vmem:[%s1153_s1 + $0x1c8] sm:$0xff] }
  0x1a   :  { %v776_v28 = vpack.c.bf16 %v475_v27, %v474_v26  ;;  %v779_v31 = vpack.c.bf16 %v477_v30, %v476_v29  ;;  %v449_v32 = vld [vmem:[%s1154_s2 + $0x1] ss:$0 sm:$0xff]  ;;  %v479_v38 = vld [vmem:[%s1153_s1 + $0x1d8] sm:$0xff]  ;;  %v482_v43 = vld [vmem:[%s1153_s1 + $0x1f0] sm:$0xff] }
  0x1b   :  { %735 = vmatpush3.bf16.msra.mxu1 %v734_v44  ;;  %v483_v44 = vld [vmem:[%s1153_s1 + $0x1f8] sm:$0xff]  ;;  %v467_v46 = vld [vmem:[%s1154_s2 + $0x2] ss:$0 sm:$0xff] }
  0x1c   :  { %714 = vmatpush3.bf16.msra.mxu0 %v713_v37  ;;  %736 = vmatprep.subr.bf16.mxu1 %v851_v3  ;;  %v478_v37 = vld [vmem:[%s1153_s1 + $0x1d0] sm:$0xff]  ;;  %v788_v45 = vpack.c.bf16 %v483_v44, %v482_v43 }
  0x1d   :  { %715 = vmatprep.subr.bf16.mxu0 %v851_v3  ;;  %v782_v39 = vpack.c.bf16 %v479_v38, %v478_v37 }
  0x1f   :  { %738 = vmatpush3.bf16.msra.mxu1 %v737_v47 }
  0x20   :  { %717 = vmatpush3.bf16.msra.mxu0 %v716_v40  ;;  %739 = vmatprep.subr.bf16.mxu1 %v851_v3  ;;  %v480_v40 = vld [vmem:[%s1153_s1 + $0x1e0] sm:$0xff] }
  0x21   :  { %742 = vmatprep.subr.bf16.mxu0 %v851_v3 }
  0x23   :  { %587 = vmatmul.mubr.f32.vlgmr.msra.gmra.mrb[0].mxu0 %v18_v41  ;;  %741 = vmatpush3.bf16.msra.mxu1 %v740_v50  ;;  %v481_v41 = vld [vmem:[%s1153_s1 + $0x1e8] sm:$0xff] }
  0x24   :  { %656 = vmatprep.mubr.msk.f32.mxu0 %vm852_vm0, %v853_v6  ;;  %766 = vmatprep.subr.bf16.mxu1 %v851_v3  ;;  %v785_v42 = vpack.c.bf16 %v481_v41, %v480_v40 }
  0x25   :  { %744 = vmatpush3.bf16.msra.mxu0 %v743_v54 }
  0x26   :  { %745 = vmatprep.subr.bf16.mxu0 %v851_v3 }
  0x29   :  { %747 = vmatpush3.bf16.msra.mxu0 %v746_v56 }
  0x2a   :  { %748 = vmatprep.subr.bf16.mxu0 %v851_v3 }
  0x2d   :  { %750 = vmatpush3.bf16.msra.mxu0 %v749_v59 }
  0x2e   :  { %751 = vmatprep.subr.bf16.mxu0 %v851_v3 }
  0x31   :  { %753 = vmatpush3.bf16.msra.mxu0 %v752_v62 }
  0x32   :  { %754 = vmatprep.subr.bf16.mxu0 %v851_v3 }
  0x35   :  { %756 = vmatpush3.bf16.msra.mxu0 %v755_v1 }
  0x36   :  { %757 = vmatprep.subr.bf16.mxu0 %v851_v3 }
  0x39   :  { %759 = vmatpush3.bf16.msra.mxu0 %v758_v11 }
  0x3a   :  { %760 = vmatprep.subr.bf16.mxu0 %v851_v3 }
  0xf6   :  { %v108_v4 = vpop.f32.mrb[0].mxu0 }
  0xf7   :  { %v109_v5 = vadd.f32 %v431_v2, %v108_v4  ;;  %v588_v7 = vpop.f32.mrb[1].mxu0 }
  0xf9   :  { %795 = vtanh.f32 %v109_v5 }
 0x103   :  { %v796_v8 = vpop.eup %795 }
 0x104   :  { %622 = vmatmul.mubr.f32.vlgmr.msra.gmra.mrb[0].mxu1 %v796_v8 }
 0x105   :  { %691 = vmatprep.mubr.msk.f32.mxu1 %vm852_vm0, %v853_v6  ;;  %v463_v6 = vld [vmem:[%s1153_s1 + $0x168] sm:$0xff]  ;;  %768 = vmatpush3.bf16.msra.mxu1 %v767_v20 }
 0x106   :  { %v761_v13 = vpack.c.bf16 %v463_v6, %v462_v12  ;;  %769 = vmatprep.subr.bf16.mxu1 %v851_v3 }
 0x108   :  { %762 = vmatpush3.bf16.msra.mxu0 %v761_v13 }
 0x109   :  { %763 = vmatprep.subr.bf16.mxu0 %v851_v3  ;;  %771 = vmatpush3.bf16.msra.mxu1 %v770_v22 }
 0x10a   :  { %772 = vmatprep.subr.bf16.mxu1 %v851_v3 }
 0x10c   :  { %765 = vmatpush3.bf16.msra.mxu0 %v764_v16 }
 0x10d   :  { %774 = vmatpush3.bf16.msra.mxu1 %v773_v25 }
 0x10e   :  { %775 = vmatprep.subr.bf16.mxu1 %v851_v3 }
 0x111   :  { %777 = vmatpush3.bf16.msra.mxu1 %v776_v28 }
 0x112   :  { %778 = vmatprep.subr.bf16.mxu1 %v851_v3 }
 0x115   :  { %780 = vmatpush3.bf16.msra.mxu1 %v779_v31 }
 0x116   :  { %781 = vmatprep.subr.bf16.mxu1 %v851_v3 }
 0x119   :  { %783 = vmatpush3.bf16.msra.mxu1 %v782_v39 }
 0x11a   :  { %784 = vmatprep.subr.bf16.mxu1 %v851_v3 }
 0x11d   :  { %786 = vmatpush3.bf16.msra.mxu1 %v785_v42 }
 0x11e   :  { %787 = vmatprep.subr.bf16.mxu1 %v851_v3 }
 0x121   :  { %789 = vmatpush3.bf16.msra.mxu1 %v788_v45 }
 0x1d7   :  { %v204_v33 = vpop.f32.mrb[0].mxu1 }
 0x1d8   :  { %v205_v34 = vadd.f32 %v449_v32, %v204_v33  ;;  %v623_v35 = vpop.f32.mrb[1].mxu1 }
 0x1da   :  { %797 = vtanh.f32 %v205_v34 }
 0x1e4   :  { %v798_v36 = vpop.eup %797 }
 0x1e5   :  { %401 = vst [vmem:[#allocation2] sm:$0xff] %v798_v36  ;;  %657 = vmatmul.mubr.f32.vlgmr.msra.gmra.mrb[2].mxu0 %v798_v36 }
 0x2b8   :  { %v300_v47 = vpop.f32.mrb[2].mxu0 }
 0x2b9   :  { %v301_v48 = vadd.f32 %v467_v46, %v300_v47  ;;  %v658_v49 = vpop.f32.mrb[3].mxu0 }
 0x2bb   :  { %799 = vtanh.f32 %v301_v48 }
 0x2c5   :  { %v800_v50 = vpop.eup %799 }
 0x2c6   :  { %692 = vmatmul.mubr.f32.vlgmr.msra.gmra.mrb[2].mxu1 %v800_v50 }
 0x2c7   :  { %814 = shalt.err (!%p811_p4)
}
 0x2c8   :  { %s815_s22 = scalar_lea.hbm %s1155_s3, 128 }
 0x2c9   :  { %p816_p5 = scmp.ne.s32.totalorder %s1155_s3, %s815_s22  ;;  %p819_p6 = scmp.lt.u32.totalorder %s815_s22, %s1155_s3 }
 0x2cb   :  { %p821_p7 = pnand %p819_p6, %p816_p5 }
 0x2cd   :  { %824 = shalt.err (!%p821_p7)
}
 0x2ce   :  { %412 = dma.vmem_to_hbm [thread:$0]  %s410_s19, 128, %s1155_s3, [#allocation3]   ;;  %v485_v3 = vld [vmem:[%s1154_s2 + $0x3] ss:$0 sm:$0xff] }
 0x2cf   :  { %s855_s30 = smov [#allocation4]  }
 0x2d0   :  { %s419_s5 = sshll.u32 %s855_s30, 4  ;;  %s420_s5 = int_to_ptr.vmem [resolvable:$true] %s419_s5 }
 0x2d1   :  { %s825_s6 = scalar_lea.vmem %s420_s5, 128  ;;  %p830_p9 = scmp.lt.s32.totalorder %s420_s5, %s420_s5 }
 0x2d2   :  { %p826_p8 = scmp.ne.s32.totalorder %s420_s5, %s825_s6  ;;  %p831_p10 = scmp.lt.s32.totalorder %s825_s6, %s825_s6 }
 0x2d4   :  { %p832_p11 = por %p831_p10, %p830_p9 }
 0x2d6   :  { %p833_p12 = pnand %p832_p11, %p826_p8 }
 0x399   :  { %v396_v51 = vpop.f32.mrb[2].mxu1 }
 0x39a   :  { %v397_v52 = vadd.f32 %v485_v3, %v396_v51  ;;  %v693_v53 = vpop.f32.mrb[3].mxu1 }
 0x39c   :  { %801 = vtanh.f32 %v397_v52 }
 0x3a6   :  { %v802_v54 = vpop.eup %801 }
 0x3a7   :  { %402 = vst [vmem:[#allocation4] sm:$0xff] %v802_v54 }
 0x3a8   :  { %836 = shalt.err (!%p833_p12)
}
 0x3a9   :  { %s837_s2 = scalar_lea.hbm %s1156_s4, 128 }
 0x3aa   :  { %p838_p13 = scmp.ne.s32.totalorder %s1156_s4, %s837_s2  ;;  %p841_p0 = scmp.lt.u32.totalorder %s837_s2, %s1156_s4 }
 0x3ac   :  { %p843_p1 = pnand %p841_p0, %p838_p13 }
 0x3ae   :  { %846 = shalt.err (!%p843_p1)
}
 0x3af   :  { %422 = dma.vmem_to_hbm [thread:$0]  %s420_s5, 128, %s1156_s4, [#allocation5]  }
 0x3b0   :  { %847 = dma.done.wait [#allocation3], 128  }
 0x3b1   :  { %848 = vsyncadd [#allocation3], 4294967168 }
 0x3b2   :  { %849 = dma.done.wait [#allocation5], 128  }
 0x3b3   :  { %850 = vsyncadd [#allocation5], 4294967168 }
 0x3b4   :  { %429 = vsyncpa [#allocation3], 1 }
 0x3b5   :  { %430 = vsyncpa [#allocation5], 1 }

</bundles_post_ra>
